<compile_context>
chip_gen: v7x
topology: tpu7x:2x2x1
jax: 0.10.0
libtpu: 0.0.40
codegen_flags: <defaults>
</compile_context>

<pallas_src>
import jax
import jax.numpy as jnp
from jax.experimental import pallas as pl
from jax.experimental.pallas import tpu as pltpu


def deepset_kernel(x_ref, w1t_ref, b1_ref, w2t_ref, b2_ref,
                   sel_ref, w3rep_ref, b3_ref, w4t_ref, b4_ref, out_ref):
    """One grid step processes SB sets, flattened to SB*B rows."""
    x = x_ref[...]                                                        # (SB*B, D)

    # phi: Linear(D,H) + ReLU   (Dropout(0.2) is identity in eval mode)
    h = jnp.dot(x, w1t_ref[...], preferred_element_type=jnp.float32) + b1_ref[...]
    h = jnp.maximum(h, 0.0)                                               # (SB*B, H)
    # TODO(synk): train-mode Dropout RNG masks are not replicated (eval-mode identity).

    # phi: Linear(H,H) + ReLU
    h = jnp.dot(h, w2t_ref[...], preferred_element_type=jnp.float32) + b2_ref[...]
    h = jnp.maximum(h, 0.0)                                               # (SB*B, H)

    # pooled[s,b] = mean_h phi[s*B+b, h]; the 1/H is folded into w3rep.
    rowsum = jnp.sum(h, axis=1, keepdims=True)                            # (SB*B, 1)

    # rho Linear(B,H):  r[s,:] = pooled[s,:] @ (w3.T/H) + b3, as ONE MXU matmul:
    #   r = Sel @ (rowsum * w3rep),   Sel[s, j] = (j // B == s),  w3rep[j] = w3.T[j % B]/H
    t = rowsum * w3rep_ref[...]                                           # (SB*B, H)
    r = jnp.dot(sel_ref[...], t, preferred_element_type=jnp.float32) + b3_ref[...]
    r = jnp.maximum(r, 0.0)                                               # (SB, H)

    # rho Linear(H,L)
    out = jnp.dot(r, w4t_ref[...], preferred_element_type=jnp.float32) + b4_ref[...]
    out_ref[...] = out                                                    # (SB, L)


def prepare_params(params):
    """One-time param prep (hoisted): transpose to right-multiply layout, reshape
    biases to (1, out) rows, and fold the hidden-mean 1/H into w3t (NOT into b3).

    PyTorch layout -> kernel layout:
      w1 (H,D)->(D,H)   w2 (H,H)->(H,H)   w3 (H,B)->(B,H)/H   w4 (L,H)->(H,L)
    """
    w1, b1, w2, b2, w3, b3, w4, b4 = params
    H = w1.shape[0]
    L = w4.shape[0]
    return (jnp.asarray(w1).T, b1.reshape(1, H),
            jnp.asarray(w2).T, b2.reshape(1, H),
            jnp.asarray(w3).T / H, b3.reshape(1, H),
            jnp.asarray(w4).T, b4.reshape(1, L))


def _sets_per_block(num_sets, batch, max_sets=16):
    """Largest SB <= max_sets dividing num_sets whose x/out blocks satisfy the
    sublane rules; falls back to one full block (always legal)."""
    for sb in range(min(max_sets, num_sets), 0, -1):
        if num_sets % sb == 0 and sb % 8 == 0 and (sb * batch) % 8 == 0:
            return sb
    return num_sets


@jax.jit
def deepset_encoder_batched(xs, prep):
    """xs: (num_sets, batch_size, input_dim) -> (num_sets, latent_dim)."""
    w1t, b1, w2t, b2, w3t, b3, w4t, b4 = prep            # w3t already scaled by 1/H
    S, B, D = xs.shape
    H = w1t.shape[1]
    L = w4t.shape[1]

    SB = _sets_per_block(S, B)                           # 16 -> grid=(4,) for S=64
    steps = S // SB

    # Flatten sets*batch in the wrapper (free plumbing) so the kernel never reshapes.
    xs_flat = xs.reshape(S * B, D)

    # Tiny per-call constants (a few KiB, fused under jit):
    # Sel[s, j] = 1 iff flattened row j belongs to set s of the block.
    sel = (jnp.arange(SB, dtype=jnp.int32)[:, None]
           == (jnp.arange(SB * B, dtype=jnp.int32)[None, :] // B)).astype(jnp.float32)
    # w3 row replicated per flattened row: w3rep[j] = w3.T[j % B] / H  (1/H pre-folded).
    w3rep = jnp.tile(w3t, (SB, 1))                       # (SB*B, H)

    const2 = lambda s: (0, 0)                            # VMEM-resident operands

    flops = int(2 * S * B * H * (D + H)                  # phi matmuls
                + 2 * steps * SB * (SB * B) * H          # pool + rho-1 matmul
                + 2 * S * H * L                          # rho-2 matmul
                + 4 * S * B * H)                         # relu / bias / reduce
    bytes_accessed = 4 * int(xs.size + S * L
                             + w1t.size + b1.size + w2t.size + b2.size
                             + sel.size + w3rep.size + b3.size + w4t.size + b4.size)

    out = pl.pallas_call(
        deepset_kernel,
        out_shape=jax.ShapeDtypeStruct((S, L), jnp.float32),
        grid=(steps,),
        in_specs=[
            pl.BlockSpec((SB * B, D), lambda s: (s, 0)),                   # streamed x
            pl.BlockSpec((D, H), const2), pl.BlockSpec((1, H), const2),    # phi linear 1
            pl.BlockSpec((H, H), const2), pl.BlockSpec((1, H), const2),    # phi linear 2
            pl.BlockSpec((SB, SB * B), const2),                            # Sel (pool)
            pl.BlockSpec((SB * B, H), const2), pl.BlockSpec((1, H), const2),  # rho linear 1
            pl.BlockSpec((H, L), const2), pl.BlockSpec((1, L), const2),    # rho linear 2
        ],
        out_specs=pl.BlockSpec((SB, L), lambda s: (s, 0)),
        compiler_params=pltpu.CompilerParams(
            dimension_semantics=("parallel",)),          # >=2 steps -> both TCs on v7x
        cost_estimate=pl.CostEstimate(
            flops=flops, transcendentals=0, bytes_accessed=bytes_accessed),
    )(xs_flat, w1t, b1, w2t, b2, sel, w3rep, b3, w4t, b4)
    return out


@jax.jit
def deepset_encoder(x, prep):
    """Single-set forward matching the PyTorch module signature: x (B,D) -> (L,).

    Per review: a pallas_call launch for ~8 KFLOP of work is pure overhead, so the
    single-set path runs as plain fused XLA; batch sets and use
    deepset_encoder_batched() for throughput.
    """
    w1t, b1, w2t, b2, w3t, b3, w4t, b4 = prep            # w3t already scaled by 1/H
    h = jnp.maximum(x @ w1t + b1, 0.0)
    h = jnp.maximum(h @ w2t + b2, 0.0)
    pooled = jnp.sum(h, axis=1)                          # sum; 1/H folded into w3t
    r = jnp.maximum(pooled @ w3t + b3[0], 0.0)           # (H,)
    return r @ w4t + b4[0]                               # (L,)


def reference(x, params):
    """Pure-JAX reference mirroring the PyTorch forward (eval mode), single set."""
    w1, b1, w2, b2, w3, b3, w4, b4 = params
    h = jnp.maximum(x @ w1.T + b1, 0.0)
    h = jnp.maximum(h @ w2.T + b2, 0.0)
    pooled = jnp.mean(h, axis=1)                         # (B,)
    r = jnp.maximum(w3 @ pooled + b3, 0.0)               # (H,)
    return w4 @ r + b4                                   # (L,)


def reference_batched(xs, params):
    return jax.vmap(lambda x: reference(x, params))(xs)


def init_params(key, batch_size, input_dim, hidden_dim, latent_dim):
    """Deterministic init; same shapes as the PyTorch module (weight: (out,in))."""
    def linear(k, out_f, in_f):
        kw, kb = jax.random.split(k)
        bound = 1.0 / jnp.sqrt(in_f)
        w = jax.random.uniform(kw, (out_f, in_f), jnp.float32, -bound, bound)
        b = jax.random.uniform(kb, (out_f,), jnp.float32, -bound, bound)
        return w, b

    k1, k2, k3, k4 = jax.random.split(key, 4)
    w1, b1 = linear(k1, hidden_dim, input_dim)    # phi[0]
    w2, b2 = linear(k2, hidden_dim, hidden_dim)   # phi[3]
    w3, b3 = linear(k3, hidden_dim, batch_size)   # rho[0]
    w4, b4 = linear(k4, latent_dim, hidden_dim)   # rho[3]
    return (w1, b1, w2, b2, w3, b3, w4, b4)


if __name__ == "__main__":
    batch_size, input_dim, hidden_dim, latent_dim = 8, 16, 32, 8
    num_sets = 64                                  # many sets per pallas_call

    key = jax.random.PRNGKey(0)
    kx, kp = jax.random.split(key)
    xs = jax.random.normal(kx, (num_sets, batch_size, input_dim), jnp.float32)
    params = init_params(kp, batch_size, input_dim, hidden_dim, latent_dim)
    prep = prepare_params(params)                  # one-time transposes / 1/H fold

    latents = jax.block_until_ready(deepset_encoder_batched(xs, prep))
    expected = jax.block_until_ready(reference_batched(xs, params))
    assert latents.shape == (num_sets, latent_dim), latents.shape
    assert jnp.allclose(latents, expected, atol=1e-5, rtol=1e-5)

    # Single-set path (original module signature) — pure-XLA fast path per review.
    single = jax.block_until_ready(deepset_encoder(xs[0], prep))
    assert single.shape == (latent_dim,), single.shape
    assert jnp.allclose(single, expected[0], atol=1e-5, rtol=1e-5)

    print("KERNEL_OK")
</pallas_src>

<mosaic_0001>
module attributes {stable_mosaic.version = 11 : i64} {
  func.func @deepset_kernel(%arg0: i32, %arg1: memref<128x16xf32, #tpu.memory_space<vmem>>, %arg2: memref<16x32xf32, #tpu.memory_space<vmem>>, %arg3: memref<1x32xf32, #tpu.memory_space<vmem>>, %arg4: memref<32x32xf32, #tpu.memory_space<vmem>>, %arg5: memref<1x32xf32, #tpu.memory_space<vmem>>, %arg6: memref<16x128xf32, #tpu.memory_space<vmem>>, %arg7: memref<128x32xf32, #tpu.memory_space<vmem>>, %arg8: memref<1x32xf32, #tpu.memory_space<vmem>>, %arg9: memref<32x8xf32, #tpu.memory_space<vmem>>, %arg10: memref<1x8xf32, #tpu.memory_space<vmem>>, %arg11: memref<16x8xf32, #tpu.memory_space<vmem>>) attributes {dimension_semantics = [#tpu.dimension_semantics<parallel>], iteration_bounds = array<i64: 4>, scalar_prefetch = 0 : i64, scratch_operands = 0 : i64, tpu.core_type = #tpu.core_type<tc>, window_params = [{transform_indices = @transform_0, window_bounds = array<i64: 128, 16>}, {pipeline_mode = #tpu.pipeline_mode<synchronous>, transform_indices = @transform_1, window_bounds = array<i64: 16, 32>}, {pipeline_mode = #tpu.pipeline_mode<synchronous>, transform_indices = @transform_2, window_bounds = array<i64: 1, 32>}, {pipeline_mode = #tpu.pipeline_mode<synchronous>, transform_indices = @transform_3, window_bounds = array<i64: 32, 32>}, {pipeline_mode = #tpu.pipeline_mode<synchronous>, transform_indices = @transform_4, window_bounds = array<i64: 1, 32>}, {pipeline_mode = #tpu.pipeline_mode<synchronous>, transform_indices = @transform_5, window_bounds = array<i64: 16, 128>}, {pipeline_mode = #tpu.pipeline_mode<synchronous>, transform_indices = @transform_6, window_bounds = array<i64: 128, 32>}, {pipeline_mode = #tpu.pipeline_mode<synchronous>, transform_indices = @transform_7, window_bounds = array<i64: 1, 32>}, {pipeline_mode = #tpu.pipeline_mode<synchronous>, transform_indices = @transform_8, window_bounds = array<i64: 32, 8>}, {pipeline_mode = #tpu.pipeline_mode<synchronous>, transform_indices = @transform_9, window_bounds = array<i64: 1, 8>}, {transform_indices = @transform_10, window_bounds = array<i64: 16, 8>}]} {
    %c0 = arith.constant 0 : index
    %c0_0 = arith.constant 0 : index
    %0 = vector.load %arg1[%c0, %c0_0] : memref<128x16xf32, #tpu.memory_space<vmem>>, vector<128x16xf32>
    %c0_1 = arith.constant 0 : index
    %c0_2 = arith.constant 0 : index
    %1 = vector.load %arg2[%c0_1, %c0_2] : memref<16x32xf32, #tpu.memory_space<vmem>>, vector<16x32xf32>
    %cst = arith.constant dense<0.000000e+00> : vector<128x32xf32>
    %2 = tpu.matmul %0, %1, %cst {dimension_numbers = #tpu.dot_dimension_numbers<[1], [0], [0], [1], [0, 0, 1, 1], [], []>} : vector<128x16xf32>, vector<16x32xf32>, vector<128x32xf32> -> vector<128x32xf32>
    %c0_3 = arith.constant 0 : index
    %c0_4 = arith.constant 0 : index
    %3 = vector.load %arg3[%c0_3, %c0_4] : memref<1x32xf32, #tpu.memory_space<vmem>>, vector<1x32xf32>
    %4 = vector.broadcast %3 : vector<1x32xf32> to vector<128x32xf32>
    %5 = arith.addf %2, %4 : vector<128x32xf32>
    %cst_5 = arith.constant 0.000000e+00 : f32
    %6 = vector.broadcast %cst_5 : f32 to vector<128x32xf32>
    %7 = arith.maximumf %5, %6 : vector<128x32xf32>
    %c0_6 = arith.constant 0 : index
    %c0_7 = arith.constant 0 : index
    %8 = vector.load %arg4[%c0_6, %c0_7] : memref<32x32xf32, #tpu.memory_space<vmem>>, vector<32x32xf32>
    %cst_8 = arith.constant dense<0.000000e+00> : vector<128x32xf32>
    %9 = tpu.matmul %7, %8, %cst_8 {dimension_numbers = #tpu.dot_dimension_numbers<[1], [0], [0], [1], [0, 0, 1, 1], [], []>} : vector<128x32xf32>, vector<32x32xf32>, vector<128x32xf32> -> vector<128x32xf32>
    %c0_9 = arith.constant 0 : index
    %c0_10 = arith.constant 0 : index
    %10 = vector.load %arg5[%c0_9, %c0_10] : memref<1x32xf32, #tpu.memory_space<vmem>>, vector<1x32xf32>
    %11 = vector.broadcast %10 : vector<1x32xf32> to vector<128x32xf32>
    %12 = arith.addf %9, %11 : vector<128x32xf32>
    %cst_11 = arith.constant 0.000000e+00 : f32
    %13 = vector.broadcast %cst_11 : f32 to vector<128x32xf32>
    %14 = arith.maximumf %12, %13 : vector<128x32xf32>
    %cst_12 = arith.constant dense<0.000000e+00> : vector<128xf32>
    %15 = vector.multi_reduction <add>, %14, %cst_12 [1] : vector<128x32xf32> to vector<128xf32>
    %16 = vector.shape_cast %15 : vector<128xf32> to vector<128x1xf32>
    %c0_13 = arith.constant 0 : index
    %c0_14 = arith.constant 0 : index
    %17 = vector.load %arg7[%c0_13, %c0_14] : memref<128x32xf32, #tpu.memory_space<vmem>>, vector<128x32xf32>
    %18 = vector.broadcast %16 : vector<128x1xf32> to vector<128x32xf32>
    %19 = arith.mulf %18, %17 : vector<128x32xf32>
    %c0_15 = arith.constant 0 : index
    %c0_16 = arith.constant 0 : index
    %20 = vector.load %arg6[%c0_15, %c0_16] : memref<16x128xf32, #tpu.memory_space<vmem>>, vector<16x128xf32>
    %cst_17 = arith.constant dense<0.000000e+00> : vector<16x32xf32>
    %21 = tpu.matmul %20, %19, %cst_17 {dimension_numbers = #tpu.dot_dimension_numbers<[1], [0], [0], [1], [0, 0, 1, 1], [], []>} : vector<16x128xf32>, vector<128x32xf32>, vector<16x32xf32> -> vector<16x32xf32>
    %c0_18 = arith.constant 0 : index
    %c0_19 = arith.constant 0 : index
    %22 = vector.load %arg8[%c0_18, %c0_19] : memref<1x32xf32, #tpu.memory_space<vmem>>, vector<1x32xf32>
    %23 = vector.broadcast %22 : vector<1x32xf32> to vector<16x32xf32>
    %24 = arith.addf %21, %23 : vector<16x32xf32>
    %cst_20 = arith.constant 0.000000e+00 : f32
    %25 = vector.broadcast %cst_20 : f32 to vector<16x32xf32>
    %26 = arith.maximumf %24, %25 : vector<16x32xf32>
    %c0_21 = arith.constant 0 : index
    %c0_22 = arith.constant 0 : index
    %27 = vector.load %arg9[%c0_21, %c0_22] : memref<32x8xf32, #tpu.memory_space<vmem>>, vector<32x8xf32>
    %cst_23 = arith.constant dense<0.000000e+00> : vector<16x8xf32>
    %28 = tpu.matmul %26, %27, %cst_23 {dimension_numbers = #tpu.dot_dimension_numbers<[1], [0], [0], [1], [0, 0, 1, 1], [], []>} : vector<16x32xf32>, vector<32x8xf32>, vector<16x8xf32> -> vector<16x8xf32>
    %c0_24 = arith.constant 0 : index
    %c0_25 = arith.constant 0 : index
    %29 = vector.load %arg10[%c0_24, %c0_25] : memref<1x8xf32, #tpu.memory_space<vmem>>, vector<1x8xf32>
    %30 = vector.broadcast %29 : vector<1x8xf32> to vector<16x8xf32>
    %31 = arith.addf %28, %30 : vector<16x8xf32>
    %c0_26 = arith.constant 0 : index
    %c0_27 = arith.constant 0 : index
    %32 = vector.load %arg11[%c0_26, %c0_27] : memref<16x8xf32, #tpu.memory_space<vmem>>, vector<16x8xf32>
    tpu.vector_store %arg11[%c0_26, %c0_27], %31 {strides = array<i32>} : memref<16x8xf32, #tpu.memory_space<vmem>>, vector<16x8xf32>,
    return
  }
  func.func @transform_0(%arg0: i32) -> (i32, i32) {
    %c0_i32 = arith.constant 0 : i32
    %c0_i32_0 = arith.constant 0 : i32
    return %arg0, %c0_i32 : i32, i32
  }
  func.func @transform_1(%arg0: i32) -> (i32, i32) {
    %c0_i32 = arith.constant 0 : i32
    %c0_i32_0 = arith.constant 0 : i32
    %c0_i32_1 = arith.constant 0 : i32
    return %c0_i32, %c0_i32_0 : i32, i32
  }
  func.func @transform_2(%arg0: i32) -> (i32, i32) {
    %c0_i32 = arith.constant 0 : i32
    %c0_i32_0 = arith.constant 0 : i32
    %c0_i32_1 = arith.constant 0 : i32
    return %c0_i32, %c0_i32_0 : i32, i32
  }
  func.func @transform_3(%arg0: i32) -> (i32, i32) {
    %c0_i32 = arith.constant 0 : i32
    %c0_i32_0 = arith.constant 0 : i32
    %c0_i32_1 = arith.constant 0 : i32
    return %c0_i32, %c0_i32_0 : i32, i32
  }
  func.func @transform_4(%arg0: i32) -> (i32, i32) {
    %c0_i32 = arith.constant 0 : i32
    %c0_i32_0 = arith.constant 0 : i32
    %c0_i32_1 = arith.constant 0 : i32
    return %c0_i32, %c0_i32_0 : i32, i32
  }
  func.func @transform_5(%arg0: i32) -> (i32, i32) {
    %c0_i32 = arith.constant 0 : i32
    %c0_i32_0 = arith.constant 0 : i32
    %c0_i32_1 = arith.constant 0 : i32
    return %c0_i32, %c0_i32_0 : i32, i32
  }
  func.func @transform_6(%arg0: i32) -> (i32, i32) {
    %c0_i32 = arith.constant 0 : i32
    %c0_i32_0 = arith.constant 0 : i32
    %c0_i32_1 = arith.constant 0 : i32
    return %c0_i32, %c0_i32_0 : i32, i32
  }
  func.func @transform_7(%arg0: i32) -> (i32, i32) {
    %c0_i32 = arith.constant 0 : i32
    %c0_i32_0 = arith.constant 0 : i32
    %c0_i32_1 = arith.constant 0 : i32
    return %c0_i32, %c0_i32_0 : i32, i32
  }
  func.func @transform_8(%arg0: i32) -> (i32, i32) {
    %c0_i32 = arith.constant 0 : i32
    %c0_i32_0 = arith.constant 0 : i32
    %c0_i32_1 = arith.constant 0 : i32
    return %c0_i32, %c0_i32_0 : i32, i32
  }
  func.func @transform_9(%arg0: i32) -> (i32, i32) {
    %c0_i32 = arith.constant 0 : i32
    %c0_i32_0 = arith.constant 0 : i32
    %c0_i32_1 = arith.constant 0 : i32
    return %c0_i32, %c0_i32_0 : i32, i32
  }
  func.func @transform_10(%arg0: i32) -> (i32, i32) {
    %c0_i32 = arith.constant 0 : i32
    %c0_i32_0 = arith.constant 0 : i32
    return %arg0, %c0_i32 : i32, i32
  }
}

</mosaic_0001>

<bundles_post_ra>
// kernel: deepset_encoder_batched.1
= control target key start
LH: loop header
LB: loop body
LE: loop exit
PB: predicated region body
PF: predicated region fallthrough
CT: control target
= control target key end

     0   :  { %s1476_s13 = smov 0   ;;  %s1679_s0 = inlined_call_operand.vmem [shape: f32[512,16], index: 0, kind: input, shape index: {}]   ;;  %s1680_s1 = inlined_call_operand.vmem [shape: f32[16,32], index: 1, kind: input, shape index: {}]   ;;  %s1681_s2 = inlined_call_operand.vmem [shape: f32[1,32], index: 2, kind: input, shape index: {}]   ;;  %s1682_s3 = inlined_call_operand.vmem [shape: f32[32,32], index: 3, kind: input, shape index: {}]   ;;  %s1683_s4 = inlined_call_operand.vmem [shape: f32[1,32], index: 4, kind: input, shape index: {}]   ;;  %s1684_s5 = inlined_call_operand.vmem [shape: f32[16,128], index: 5, kind: input, shape index: {}]   ;;  %s1685_s6 = inlined_call_operand.vmem [shape: f32[128,32], index: 6, kind: input, shape index: {}]   ;;  %s1686_s7 = inlined_call_operand.vmem [shape: f32[1,32], index: 7, kind: input, shape index: {}]   ;;  %s1687_s8 = inlined_call_operand.vmem [shape: f32[32,8], index: 8, kind: input, shape index: {}]   ;;  %s1688_s9 = inlined_call_operand.vmem [shape: f32[1,8], index: 9, kind: input, shape index: {}]   ;;  %s1689_s10 = inlined_call_operand.vmem [shape: f32[64,8], index: 10, kind: output, shape index: {}]  }
   0x1 LB: > { %s1136_s14 = sadd.s32 4294967295, %s1419_s13   ;;  %p1140_p0 = scmp.ge.s32.totalorder %s1419_s13, 1  ;;  %s1419_s13 = sphi %s1476_s13, %s20_s13  }
   0x2   : > { %p313_p1 = scmp.lt.s32.totalorder %s1419_s13, 5 }
   0x4   : > { %p314_p2 = pnand %p1140_p0, %p313_p1 }
   0x5   : > { %v379_v0 = vld [vmem:[%s1680_s1] sm:$0xff] (!%p314_p2)  ;;  %v380_v1 = vld [vmem:[%s1680_s1 + $0x8] sm:$0xff] (!%p314_p2)  ;;  %s1141_s19 = sshll.u32 (!%p314_p2), %s1136_s14, 4  ;;  %vm388_vm0 = vcmask (!%p314_p2), 130048   ;;  %v600_v22 = vld [vmem:[%s1682_s3 + $0x10] sm:$0xff] (!%p314_p2)  ;;  %vm609_vm1 = vcmask (!%p314_p2), 261120  }
   0x6   : > { %317 = sbr.rel (%p314_p2) target bundleno = 1070 (0x42e), region = 60  ;;  %v598_v2 = vld [vmem:[%s1682_s3] sm:$0xff] (!%p314_p2)  ;;  %v1353_v3 = vpack.c.bf16 (!%p314_p2), %v380_v1, %v379_v0  ;;  %p352_p3 = scmp.lt.s32.totalorder (!%p314_p2), %s1141_s19, 63  ;;  %v599_v4 = vld [vmem:[%s1682_s3 + $0x8] sm:$0xff] (!%p314_p2)  ;;  %v601_v23 = vld [vmem:[%s1682_s3 + $0x18] sm:$0xff] (!%p314_p2)  ;;  %vm1077_vm2 = vcmask (!%p314_p2), 64512  }
   0x7   : > { %v1357_v5 = vpack.c.bf16 (!%p314_p2), %v599_v4, %v598_v2  ;;  %v1361_v24 = vpack.c.bf16 (!%p314_p2), %v601_v23, %v600_v22  ;;  %v1145_v25 = vld [vmem:[%s1681_s2] ss:$0 sm:$0xff] (!%p314_p2)  ;;  %s1143_s28 = sshll.u32 (!%p314_p2), %s1136_s14, 1 }
   0x8   : > { %1354 = vmatprep.subr.bf16.mxu0 (!%p314_p2), %v1353_v3  ;;  %p358_p4 = scmp.lt.s32.totalorder (!%p314_p2), %s1143_s28, 7 }
   0x9   : > { %1356 = vmatpush3.bf16.msra.mxu0 (!%p314_p2), %v1353_v3  ;;  %1358 = vmatprep.subr.bf16.mxu1 (!%p314_p2), %v1357_v5 }
   0xa   : > { %1360 = vmatpush3.bf16.msra.mxu1 (!%p314_p2), %v1357_v5 }
   0xb   : > { %1362 = vmatprep.subr.bf16.mxu1 (!%p314_p2), %v1361_v24 }
   0xd   : > { %s1691_s19 = smov (!%p352_p3, %s1141_s19), 63  ;;  %s1693_s28 = smov (!%p358_p4, %s1143_s28), 7 }
   0xe   : > { %s1142_s24 = sshll.u32 %s1691_s19, 3  ;;  %1364 = vmatpush3.bf16.msra.mxu1 %v1361_v24  ;;  %s1144_s29 = sshll.u32 %s1693_s28, 3 }
   0xf   : > { %s1501_s27 = scalar_lea.vmem %s1679_s0, %s1142_s24  ;;  %s361_s16 = scalar_lea.vmem %s1689_s10, %s1144_s29 }
  0x10   : > { %v363_v6 = vld [vmem:[%s1501_s27] sm:$0xff]  ;;  %v364_v7 = vld [vmem:[%s1501_s27 + $0x8] sm:$0xff]  ;;  %v365_v8 = vld [vmem:[%s1501_s27 + $0x10] sm:$0xff] }
  0x11   : > { %1251 = vmatprep.mubr.msk.f32.mxu0 %vm388_vm0, %v363_v6  ;;  %v366_v9 = vld [vmem:[%s1501_s27 + $0x18] sm:$0xff]  ;;  %v367_v10 = vld [vmem:[%s1501_s27 + $0x20] sm:$0xff]  ;;  %v368_v11 = vld [vmem:[%s1501_s27 + $0x28] sm:$0xff] }
  0x12   : > { %1252 = vmatmul.mubr.msk.f32.vlgmr.msra.gmra.mrb[0].mxu0 %vm388_vm0, %v364_v7  ;;  %v369_v12 = vld [vmem:[%s1501_s27 + $0x30] sm:$0xff]  ;;  %v370_v13 = vld [vmem:[%s1501_s27 + $0x38] sm:$0xff]  ;;  %v371_v14 = vld [vmem:[%s1501_s27 + $0x40] sm:$0xff] }
  0x13   : > { %1254 = vmatprep.mubr.msk.f32.mxu0 %vm388_vm0, %v365_v8  ;;  %v372_v15 = vld [vmem:[%s1501_s27 + $0x48] sm:$0xff]  ;;  %v373_v16 = vld [vmem:[%s1501_s27 + $0x50] sm:$0xff]  ;;  %v374_v17 = vld [vmem:[%s1501_s27 + $0x58] sm:$0xff] }
  0x14   : > { %v375_v18 = vld [vmem:[%s1501_s27 + $0x60] sm:$0xff]  ;;  %v376_v19 = vld [vmem:[%s1501_s27 + $0x68] sm:$0xff]  ;;  %v377_v20 = vld [vmem:[%s1501_s27 + $0x70] sm:$0xff] }
  0x15   : > { %v378_v21 = vld [vmem:[%s1501_s27 + $0x78] sm:$0xff] }
  0x16   : > { %1255 = vmatmul.mubr.msk.f32.gmra.mrb[2].mxu0 %vm388_vm0, %v366_v9 }
  0x17   : > { %1257 = vmatprep.mubr.msk.f32.mxu0 %vm388_vm0, %v367_v10  ;;  %v1563_v10 = vld [vmem:[%s1683_s4] ss:$0 sm:$0xff] }
  0x1a   : > { %1258 = vmatmul.mubr.msk.f32.gmra.mrb[4].mxu0 %vm388_vm0, %v368_v11 }
  0x1b   : > { %1260 = vmatprep.mubr.msk.f32.mxu0 %vm388_vm0, %v369_v12 }
  0x1e   : > { %1261 = vmatmul.mubr.msk.f32.gmra.mrb[6].mxu0 %vm388_vm0, %v370_v13 }
  0x1f   : > { %1263 = vmatprep.mubr.msk.f32.mxu0 %vm388_vm0, %v371_v14 }
  0x22   : > { %1264 = vmatmul.mubr.msk.f32.gmra.mrb[8].mxu0 %vm388_vm0, %v372_v15 }
  0x23   : > { %1266 = vmatprep.mubr.msk.f32.mxu0 %vm388_vm0, %v373_v16 }
  0x26   : > { %1267 = vmatmul.mubr.msk.f32.gmra.mrb[10].mxu0 %vm388_vm0, %v374_v17 }
  0x27   : > { %1269 = vmatprep.mubr.msk.f32.mxu0 %vm388_vm0, %v375_v18 }
  0x2a   : > { %1270 = vmatmul.mubr.msk.f32.gmra.mrb[12].mxu0 %vm388_vm0, %v376_v19 }
  0x2b   : > { %1272 = vmatprep.mubr.msk.f32.mxu0 %vm388_vm0, %v377_v20 }
  0x2e   : > { %1273 = vmatmul.mubr.msk.f32.gmra.mrb[14].mxu0 %vm388_vm0, %v378_v21 }
  0xe5   : > { %v1253_v26 = vpop.f32.mrb[0].mxu0 }
  0xe6   : > { %v509_v27 = vadd.f32 %v1253_v26, %v1145_v25  ;;  %v503_v28 = vpop.f32.mrb[1].mxu0 }
  0xe7   : > { %v504_v29 = vadd.f32 %v1145_v25, %v503_v28 }
  0xe8   : > { %v583_v32 = vmax.f32 %v509_v27, 0.0 }
  0xe9   : > { %v582_v30 = vmax.f32 %v504_v29, 0.0  ;;  %v1256_v31 = vpop.f32.mrb[2].mxu0 }
  0xea   : > { %v519_v33 = vadd.f32 %v1256_v31, %v1145_v25  ;;  %v513_v34 = vpop.f32.mrb[3].mxu0 }
  0xeb   : > { %v514_v35 = vadd.f32 %v1145_v25, %v513_v34  ;;  %1283 = vmatprep.mubr.msk.f32.mxu1 %vm609_vm1, %v582_v30 }
  0xec   : > { %v585_v36 = vmax.f32 %v519_v33, 0.0  ;;  %1284 = vmatmul.mubr.msk.f32.vlgmr.msra.gmra.mrb[0].mxu1 %vm609_vm1, %v583_v32 }
  0xed   : > { %v584_v37 = vmax.f32 %v514_v35, 0.0  ;;  %v1259_v38 = vpop.f32.mrb[4].mxu0 }
  0xee   : > { %v529_v39 = vadd.f32 %v1259_v38, %v1145_v25  ;;  %v523_v40 = vpop.f32.mrb[5].mxu0 }
  0xef   : > { %v524_v41 = vadd.f32 %v1145_v25, %v523_v40  ;;  %1286 = vmatprep.mubr.msk.f32.mxu1 %vm609_vm1, %v584_v37 }
  0xf0   : > { %v587_v42 = vmax.f32 %v529_v39, 0.0  ;;  %1287 = vmatmul.mubr.msk.f32.gmra.mrb[2].mxu1 %vm609_vm1, %v585_v36 }
  0xf1   : > { %v586_v43 = vmax.f32 %v524_v41, 0.0  ;;  %v1262_v44 = vpop.f32.mrb[6].mxu0 }
  0xf2   : > { %v539_v45 = vadd.f32 %v1262_v44, %v1145_v25  ;;  %v533_v46 = vpop.f32.mrb[7].mxu0 }
  0xf3   : > { %v534_v47 = vadd.f32 %v1145_v25, %v533_v46  ;;  %1289 = vmatprep.mubr.msk.f32.mxu1 %vm609_vm1, %v586_v43 }
  0xf4   : > { %v589_v48 = vmax.f32 %v539_v45, 0.0  ;;  %1290 = vmatmul.mubr.msk.f32.gmra.mrb[4].mxu1 %vm609_vm1, %v587_v42 }
  0xf5   : > { %v588_v49 = vmax.f32 %v534_v47, 0.0  ;;  %v1265_v50 = vpop.f32.mrb[8].mxu0 }
  0xf6   : > { %v549_v51 = vadd.f32 %v1265_v50, %v1145_v25  ;;  %v543_v52 = vpop.f32.mrb[9].mxu0 }
  0xf7   : > { %v544_v53 = vadd.f32 %v1145_v25, %v543_v52  ;;  %1292 = vmatprep.mubr.msk.f32.mxu1 %vm609_vm1, %v588_v49 }
  0xf8   : > { %v591_v54 = vmax.f32 %v549_v51, 0.0  ;;  %1293 = vmatmul.mubr.msk.f32.gmra.mrb[6].mxu1 %vm609_vm1, %v589_v48 }
  0xf9   : > { %v590_v55 = vmax.f32 %v544_v53, 0.0  ;;  %v1268_v56 = vpop.f32.mrb[10].mxu0 }
  0xfa   : > { %v559_v57 = vadd.f32 %v1268_v56, %v1145_v25  ;;  %v553_v58 = vpop.f32.mrb[11].mxu0 }
  0xfb   : > { %v554_v59 = vadd.f32 %v1145_v25, %v553_v58  ;;  %1295 = vmatprep.mubr.msk.f32.mxu1 %vm609_vm1, %v590_v55 }
  0xfc   : > { %v593_v60 = vmax.f32 %v559_v57, 0.0  ;;  %1296 = vmatmul.mubr.msk.f32.gmra.mrb[8].mxu1 %vm609_vm1, %v591_v54 }
  0xfd   : > { %v592_v61 = vmax.f32 %v554_v59, 0.0  ;;  %v1271_v62 = vpop.f32.mrb[12].mxu0 }
  0xfe   : > { %v569_v63 = vadd.f32 %v1271_v62, %v1145_v25  ;;  %v563_v0 = vpop.f32.mrb[13].mxu0 }
  0xff   : > { %v564_v1 = vadd.f32 %v1145_v25, %v563_v0  ;;  %1298 = vmatprep.mubr.msk.f32.mxu1 %vm609_vm1, %v592_v61 }
 0x100   : > { %v595_v2 = vmax.f32 %v569_v63, 0.0  ;;  %1299 = vmatmul.mubr.msk.f32.gmra.mrb[10].mxu1 %vm609_vm1, %v593_v60 }
 0x101   : > { %v594_v3 = vmax.f32 %v564_v1, 0.0  ;;  %v1274_v4 = vpop.f32.mrb[14].mxu0 }
 0x102   : > { %v579_v5 = vadd.f32 %v1274_v4, %v1145_v25  ;;  %v573_v6 = vpop.f32.mrb[15].mxu0 }
 0x103   : > { %v574_v7 = vadd.f32 %v1145_v25, %v573_v6  ;;  %1301 = vmatprep.mubr.msk.f32.mxu1 %vm609_vm1, %v594_v3 }
 0x104   : > { %v597_v8 = vmax.f32 %v579_v5, 0.0  ;;  %1302 = vmatmul.mubr.msk.f32.gmra.mrb[12].mxu1 %vm609_vm1, %v595_v2 }
 0x105   : > { %v596_v9 = vmax.f32 %v574_v7, 0.0 }
 0x107   : > { %1304 = vmatprep.mubr.msk.f32.mxu1 %vm609_vm1, %v596_v9 }
 0x108   : > { %1305 = vmatmul.mubr.msk.f32.gmra.mrb[14].mxu1 %vm609_vm1, %v597_v8 }
 0x1bf   : > { %v1285_v11 = vpop.f32.mrb[0].mxu1 }
 0x1c0   : > { %v724_v12 = vpop.f32.mrb[1].mxu1  ;;  %v730_v13 = vadd.f32 %v1285_v11, %v1563_v10 }
 0x1c1   : > { %v725_v14 = vadd.f32 %v1563_v10, %v724_v12  ;;  %v899_v12 = vld [vmem:[%s1684_s5] sm:$0xff] }
 0x1c2   : > { %v804_v19 = vmax.f32 %v730_v13, 0.0  ;;  %1339 = vmatprep.mubr.f32.mxu0 %v899_v12  ;;  %v986_v13 = vld [vmem:[%s1687_s8 + $0x8] sm:$0xff]  ;;  %v1179_v12 = vld [vmem:[%s1686_s7] ss:$0 sm:$0xff] }
 0x1c3   : > { %v803_v15 = vmax.f32 %v725_v14, 0.0  ;;  %v1288_v16 = vpop.f32.mrb[2].mxu1  ;;  %v987_v14 = vld [vmem:[%s1687_s8 + $0x10] sm:$0xff] }
 0x1c4   : > { %v740_v17 = vadd.f32 %v1288_v16, %v1563_v10  ;;  %v734_v18 = vpop.f32.mrb[3].mxu1  ;;  %v822_v29 = vsel %vm609_vm1, %v804_v19, 0.0  ;;  %v988_v16 = vld [vmem:[%s1687_s8 + $0x18] sm:$0xff]  ;;  %v867_v19 = vld [vmem:[%s1685_s6] sm:$0xff] }
 0x1c5   : > { %v735_v20 = vadd.f32 %v1563_v10, %v734_v18  ;;  %v819_v21 = vsel %vm609_vm1, %v803_v15, 0.0 }
 0x1c6   : > { %v806_v22 = vmax.f32 %v740_v17, 0.0  ;;  %820 = vadd.xlane.f32.xlu0 %v819_v21  ;;  %v1401_v17 = vpack.c.bf16 %v988_v16, %v987_v14 }
 0x1c7   : > { %v1291_v23 = vpop.f32.mrb[4].mxu1  ;;  %v805_v24 = vmax.f32 %v735_v20, 0.0  ;;  %v868_v20 = vld [vmem:[%s1685_s6 + $0x8] sm:$0xff] }
 0x1c8   : > { %v750_v25 = vadd.f32 %v1291_v23, %v1563_v10  ;;  %v828_v26 = vsel %vm609_vm1, %v806_v22, 0.0  ;;  %v744_v27 = vpop.f32.mrb[5].mxu1 }
 0x1c9   : > { %829 = vadd.xlane.f32.xlu1 %v828_v26  ;;  %v745_v28 = vadd.f32 %v1563_v10, %v744_v27  ;;  %v825_v35 = vsel %vm609_vm1, %v805_v24, 0.0  ;;  %v870_v24 = vld [vmem:[%s1685_s6 + $0x18] sm:$0xff]  ;;  %v869_v26 = vld [vmem:[%s1685_s6 + $0x10] sm:$0xff] }
 0x1ca   : > { %823 = vadd.xlane.f32.xlu0 %v822_v29  ;;  %v808_v32 = vmax.f32 %v750_v25, 0.0 }
 0x1cb   : > { %v807_v30 = vmax.f32 %v745_v28, 0.0  ;;  %v1294_v31 = vpop.f32.mrb[6].mxu1 }
 0x1cc   : > { %v760_v33 = vadd.f32 %v1294_v31, %v1563_v10  ;;  %v754_v34 = vpop.f32.mrb[7].mxu1  ;;  %v834_v43 = vsel %vm609_vm1, %v808_v32, 0.0  ;;  %v871_v32 = vld [vmem:[%s1685_s6 + $0x20] sm:$0xff] }
 0x1cd   : > { %v755_v36 = vadd.f32 %v1563_v10, %v754_v34  ;;  %826 = vadd.xlane.f32.xlu1 %v825_v35  ;;  %v831_v37 = vsel %vm609_vm1, %v807_v30, 0.0 }
 0x1ce   : > { %832 = vadd.xlane.f32.xlu0 %v831_v37  ;;  %v810_v40 = vmax.f32 %v760_v33, 0.0  ;;  %v872_v33 = vld [vmem:[%s1685_s6 + $0x28] sm:$0xff] }
 0x1cf   : > { %v809_v38 = vmax.f32 %v755_v36, 0.0  ;;  %v1297_v39 = vpop.f32.mrb[8].mxu1 }
 0x1d0   : > { %v770_v41 = vadd.f32 %v1297_v39, %v1563_v10  ;;  %v764_v42 = vpop.f32.mrb[9].mxu1  ;;  %v840_v51 = vsel %vm609_vm1, %v810_v40, 0.0  ;;  %v873_v39 = vld [vmem:[%s1685_s6 + $0x30] sm:$0xff]  ;;  %v874_v40 = vld [vmem:[%s1685_s6 + $0x38] sm:$0xff] }
 0x1d1   : > { %v765_v44 = vadd.f32 %v1563_v10, %v764_v42  ;;  %835 = vadd.xlane.f32.xlu1 %v834_v43  ;;  %v837_v45 = vsel %vm609_vm1, %v809_v38, 0.0 }
 0x1d2   : > { %838 = vadd.xlane.f32.xlu0 %v837_v45  ;;  %v812_v48 = vmax.f32 %v770_v41, 0.0 }
 0x1d3   : > { %v811_v46 = vmax.f32 %v765_v44, 0.0  ;;  %v1300_v47 = vpop.f32.mrb[10].mxu1 }
 0x1d4   : > { %v780_v49 = vadd.f32 %v1300_v47, %v1563_v10  ;;  %v774_v50 = vpop.f32.mrb[11].mxu1  ;;  %v846_v59 = vsel %vm609_vm1, %v812_v48, 0.0  ;;  %v876_v47 = vld [vmem:[%s1685_s6 + $0x48] sm:$0xff] }
 0x1d5   : > { %v775_v52 = vadd.f32 %v1563_v10, %v774_v50  ;;  %841 = vadd.xlane.f32.xlu1 %v840_v51  ;;  %v843_v53 = vsel %vm609_vm1, %v811_v46, 0.0  ;;  %v875_v46 = vld [vmem:[%s1685_s6 + $0x40] sm:$0xff] }
 0x1d6   : > { %844 = vadd.xlane.f32.xlu0 %v843_v53  ;;  %v814_v56 = vmax.f32 %v780_v49, 0.0  ;;  %v877_v53 = vld [vmem:[%s1685_s6 + $0x50] sm:$0xff] }
 0x1d7   : > { %v813_v54 = vmax.f32 %v775_v52, 0.0  ;;  %v1303_v55 = vpop.f32.mrb[12].mxu1 }
 0x1d8   : > { %v790_v57 = vadd.f32 %v1303_v55, %v1563_v10  ;;  %v784_v58 = vpop.f32.mrb[13].mxu1  ;;  %v852_v3 = vsel %vm609_vm1, %v814_v56, 0.0 }
 0x1d9   : > { %v785_v60 = vadd.f32 %v1563_v10, %v784_v58  ;;  %847 = vadd.xlane.f32.xlu1 %v846_v59  ;;  %v849_v61 = vsel %vm609_vm1, %v813_v54, 0.0  ;;  %v878_v54 = vld [vmem:[%s1685_s6 + $0x58] sm:$0xff] }
 0x1da   : > { %850 = vadd.xlane.f32.xlu0 %v849_v61  ;;  %v816_v0 = vmax.f32 %v790_v57, 0.0  ;;  %v880_v61 = vld [vmem:[%s1685_s6 + $0x68] sm:$0xff] }
 0x1db   : > { %v815_v62 = vmax.f32 %v785_v60, 0.0  ;;  %v1306_v63 = vpop.f32.mrb[14].mxu1  ;;  %v879_v60 = vld [vmem:[%s1685_s6 + $0x60] sm:$0xff] }
 0x1dc   : > { %v800_v1 = vadd.f32 %v1306_v63, %v1563_v10  ;;  %v794_v2 = vpop.f32.mrb[15].mxu1  ;;  %v858_v8 = vsel %vm609_vm1, %v816_v0, 0.0 }
 0x1dd   : > { %v795_v4 = vadd.f32 %v1563_v10, %v794_v2  ;;  %853 = vadd.xlane.f32.xlu1 %v852_v3  ;;  %v855_v5 = vsel %vm609_vm1, %v815_v62, 0.0  ;;  %v985_v10 = vld [vmem:[%s1687_s8] sm:$0xff]  ;;  %v881_v2 = vld [vmem:[%s1685_s6 + $0x70] sm:$0xff] }
 0x1de   : > { %856 = vadd.xlane.f32.xlu0 %v855_v5  ;;  %v818_v7 = vmax.f32 %v800_v1, 0.0  ;;  %v1397_v15 = vpack.c.bf16 %v986_v13, %v985_v10 }
 0x1df   : > { %v817_v6 = vmax.f32 %v795_v4, 0.0  ;;  %v882_v4 = vld [vmem:[%s1685_s6 + $0x78] sm:$0xff] }
 0x1e0   : > { %v864_v11 = vsel %vm609_vm1, %v818_v7, 0.0  ;;  %1398 = vmatprep.subr.bf16.mxu1 %v1397_v15 }
 0x1e1   : > { %859 = vadd.xlane.f32.xlu1 %v858_v8  ;;  %v861_v9 = vsel %vm609_vm1, %v817_v6, 0.0  ;;  %1400 = vmatpush3.bf16.msra.mxu1 %v1397_v15 }
 0x1e2   : > { %862 = vadd.xlane.f32.xlu0 %v861_v9  ;;  %1402 = vmatprep.subr.bf16.mxu1 %v1401_v17 }
 0x1e5   : > { %865 = vadd.xlane.f32.xlu1 %v864_v11  ;;  %1404 = vmatpush3.bf16.msra.mxu1 %v1401_v17  ;;  %v900_v11 = vld [vmem:[%s1684_s5 + $0x8] sm:$0xff] }
 0x253   : > { %v821_v18 = vpop.xlane.xlu0 %820 }
 0x254   : > { %v883_v23 = vmul.f32 %v867_v19, %v821_v18  ;;  %v1180_v18 = vld [vmem:[%s1688_s9] ss:$0 sm:$0xff] }
 0x256   : > { %v830_v21 = vpop.xlane.xlu1 %829 }
 0x257   : > { %v824_v22 = vpop.xlane.xlu0 %823  ;;  %v886_v29 = vmul.f32 %v870_v24, %v830_v21 }
 0x258   : > { %v884_v25 = vmul.f32 %v868_v20, %v824_v22 }
 0x25a   : > { %v1365_v27 = vpack.c.bf16 %v884_v25, %v883_v23  ;;  %v827_v28 = vpop.xlane.xlu1 %826 }
 0x25b   : > { %v885_v30 = vmul.f32 %v869_v26, %v827_v28  ;;  %v833_v31 = vpop.xlane.xlu0 %832 }
 0x25c   : > { %1366 = vmatprep.subr.bf16.mxu0 %v1365_v27  ;;  %v887_v36 = vmul.f32 %v871_v32, %v833_v31 }
 0x25d   : > { %v1369_v34 = vpack.c.bf16 %v886_v29, %v885_v30  ;;  %1368 = vmatpush3.bf16.msra.mxu0 %v1365_v27 }
 0x25e   : > { %v836_v35 = vpop.xlane.xlu1 %835 }
 0x25f   : > { %v888_v37 = vmul.f32 %v872_v33, %v836_v35  ;;  %1370 = vmatprep.subr.bf16.mxu0 %v1369_v34  ;;  %v839_v38 = vpop.xlane.xlu0 %838 }
 0x260   : > { %v889_v43 = vmul.f32 %v873_v39, %v839_v38 }
 0x261   : > { %v1373_v41 = vpack.c.bf16 %v888_v37, %v887_v36  ;;  %1372 = vmatpush3.bf16.msra.mxu0 %v1369_v34 }
 0x262   : > { %v842_v42 = vpop.xlane.xlu1 %841 }
 0x263   : > { %v890_v44 = vmul.f32 %v874_v40, %v842_v42  ;;  %1374 = vmatprep.subr.bf16.mxu0 %v1373_v41  ;;  %v845_v45 = vpop.xlane.xlu0 %844 }
 0x264   : > { %v891_v50 = vmul.f32 %v875_v46, %v845_v45 }
 0x265   : > { %v1377_v48 = vpack.c.bf16 %v890_v44, %v889_v43  ;;  %1376 = vmatpush3.bf16.msra.mxu0 %v1373_v41 }
 0x266   : > { %v848_v49 = vpop.xlane.xlu1 %847 }
 0x267   : > { %v892_v51 = vmul.f32 %v876_v47, %v848_v49  ;;  %1378 = vmatprep.subr.bf16.mxu0 %v1377_v48  ;;  %v851_v52 = vpop.xlane.xlu0 %850 }
 0x268   : > { %v893_v57 = vmul.f32 %v877_v53, %v851_v52 }
 0x269   : > { %v1381_v55 = vpack.c.bf16 %v892_v51, %v891_v50  ;;  %1380 = vmatpush3.bf16.msra.mxu0 %v1377_v48 }
 0x26a   : > { %v854_v56 = vpop.xlane.xlu1 %853 }
 0x26b   : > { %v894_v58 = vmul.f32 %v878_v54, %v854_v56  ;;  %1382 = vmatprep.subr.bf16.mxu0 %v1381_v55  ;;  %v857_v59 = vpop.xlane.xlu0 %856 }
 0x26c   : > { %v895_v0 = vmul.f32 %v879_v60, %v857_v59 }
 0x26d   : > { %v1385_v62 = vpack.c.bf16 %v894_v58, %v893_v57  ;;  %1384 = vmatpush3.bf16.msra.mxu0 %v1381_v55 }
 0x26e   : > { %v860_v63 = vpop.xlane.xlu1 %859 }
 0x26f   : > { %v896_v1 = vmul.f32 %v880_v61, %v860_v63  ;;  %1386 = vmatprep.subr.bf16.mxu0 %v1385_v62  ;;  %v863_v3 = vpop.xlane.xlu0 %862 }
 0x270   : > { %v897_v7 = vmul.f32 %v881_v2, %v863_v3 }
 0x271   : > { %v1389_v5 = vpack.c.bf16 %v896_v1, %v895_v0  ;;  %1388 = vmatpush3.bf16.msra.mxu0 %v1385_v62 }
 0x272   : > { %v866_v6 = vpop.xlane.xlu1 %865 }
 0x273   : > { %v898_v8 = vmul.f32 %v882_v4, %v866_v6  ;;  %1390 = vmatprep.subr.bf16.mxu0 %v1389_v5 }
 0x275   : > { %v1393_v9 = vpack.c.bf16 %v898_v8, %v897_v7  ;;  %1392 = vmatpush3.bf16.msra.mxu0 %v1389_v5 }
 0x277   : > { %1394 = vmatprep.subr.bf16.mxu0 %v1393_v9 }
 0x279   : > { %1396 = vmatpush3.bf16.msra.mxu0 %v1393_v9 }
 0x27c   : > { %1340 = vmatmul.mubr.f32.vlgmr.msra.gmra.mrb[16].mxu0 %v900_v11 }
 0x34f   : > { %v1341_v10 = vpop.f32.mrb[16].mxu0 }
 0x350   : > { %v980_v13 = vadd.f32 %v1341_v10, %v1179_v12  ;;  %v974_v14 = vpop.f32.mrb[17].mxu0 }
 0x351   : > { %v975_v15 = vadd.f32 %v1179_v12, %v974_v14 }
 0x352   : > { %v984_v17 = vmax.f32 %v980_v13, 0.0 }
 0x353   : > { %v983_v16 = vmax.f32 %v975_v15, 0.0 }
 0x355   : > { %1350 = vmatprep.mubr.msk.f32.mxu1 %vm609_vm1, %v983_v16 }
 0x356   : > { %1351 = vmatmul.mubr.msk.f32.vlgmr.msra.gmra.mrb[16].mxu1 %vm609_vm1, %v984_v17 }
 0x429   : > { %v1352_v19 = vpop.f32.mrb[16].mxu1 }
 0x42a   : > { %v1068_v20 = vpop.f32.mrb[17].mxu1  ;;  %v1074_v22 = vadd.f32 %v1352_v19, %v1180_v18 }
 0x42b   : > { %v1069_v21 = vadd.f32 %v1180_v18, %v1068_v20 }
 0x42c   : > { %1079 = vst.msk [vmem:[%s361_s16 + $0x8] sm:$0xff] %vm1077_vm2, %v1074_v22 }
 0x42d   : > { %1078 = vst.msk [vmem:[%s361_s16] sm:$0xff] %vm1077_vm2, %v1069_v21 }
 0x42e PF: > { %s20_s13 = sadd.s32 1, %s1419_s13  }
 0x42f   : > { %p17_p5 = scmp.ge.s32.totalorder %s20_s13, 6  }
 0x431   :  { %19 = sbr.rel (!%p17_p5) target bundleno = 1 (0x1), region = 90 }

</bundles_post_ra>
